<compile_context>
chip_gen: v7x
topology: tpu7x:2x2x1
jax: 0.10.0
libtpu: 0.0.40
codegen_flags: <defaults>
</compile_context>

<pallas_src>
import jax
import jax.numpy as jnp
from jax.experimental import pallas as pl
from jax.experimental.pallas import tpu as pltpu


# ----------------------------- Pallas kernel --------------------------------
def action_net_kernel(x_ref, w_ref, b_ref, out_ref, acc_ref):
    # x_ref  : (sblk, F) bf16 -- chunk of the M*T frame stream, F = J*C lanes
    # w_ref  : (F, H)    f32  -- blockdiag(wb) @ w1, pre-scaled by 1/(M*T)
    # b_ref  : (1, H)    f32  -- b1 + tile(bb, J) @ w1
    # out_ref: (1, H)    f32  -- per-batch output row
    # acc_ref: (1, F)    f32  -- running sum of frames (both means collapse here)
    s = pl.program_id(1)

    @pl.when(s == 0)
    def _init():
        acc_ref[...] = jnp.zeros_like(acc_ref)

    # Hot loop: streaming sum of the x chunk over its frame axis.  No matmul and
    # no wide reduction here -- the backbone projection/fc1 are linear and are
    # applied once to the accumulated row at finalize.  (Lowered as vreg adds
    # plus a single in-vreg sublane reduce; XLU has no other work in this
    # kernel, so keeping a (8, F) sublane-aligned accumulator is unnecessary.)
    acc_ref[...] += jnp.sum(x_ref[...].astype(jnp.float32), axis=0, keepdims=True)

    @pl.when(s == pl.num_programs(1) - 1)
    def _finalize():
        # Composed (backbone -> mean -> fc1) projection + bias, then L2 normalize.
        y = jnp.dot(acc_ref[...], w_ref[...], preferred_element_type=jnp.float32)
        y = y + b_ref[...]
        ssq = jnp.sum(y * y, axis=-1, keepdims=True)
        # y * rsqrt(max(||y||^2, eps^2)) == y / max(||y||, 1e-12)  (F.normalize)
        out_ref[...] = y * jax.lax.rsqrt(jnp.maximum(ssq, 1e-24))


# ------------------------------ wrapper --------------------------------------
def action_net_forward(x, params, *, frame_block=1024):
    """x: (N, M, T, J, C) float -> (N, hidden_dim) float32, L2-normalized."""
    N, M, T, J, C = x.shape
    wb = params["wb"].astype(jnp.float32)   # (C, D)   synthetic backbone weight
    bb = params["bb"].astype(jnp.float32)   # (D,)     synthetic backbone bias
    w1 = params["w1"].astype(jnp.float32)   # (J*D, H) head fc1 weight
    b1 = params["b1"].astype(jnp.float32)   # (H,)     head fc1 bias
    D = wb.shape[1]
    H = w1.shape[1]
    S = M * T                                # frames per sequence (true count)
    F = J * C                                # lanes of the x stream

    # --- x stream: free reshape (row-major contiguous), bf16 halves HBM bytes.
    # (Ideally x is already produced in bf16 upstream so this cast fuses/ is free.)
    xf = x.reshape(N, S, F).astype(jnp.bfloat16)

    # --- compose (linear) backbone + both means + fc1 into one small weight ----
    # W_eff[(j,c), h] = sum_d wb[c,d] * w1[j*D+d, h];  scale 1/S uses the TRUE S.
    w1r = w1.reshape(J, D, H)
    w_eff = jnp.einsum("cd,jdh->jch", wb, w1r,
                       precision=jax.lax.Precision.HIGHEST).reshape(F, H)
    w_eff = w_eff * (1.0 / float(S))
    b_eff = (b1 + jnp.tile(bb, J) @ w1).reshape(1, H)

    # --- frame-chunk tiling: balance steps so zero padding is < 8 frames/step --
    num_steps = max(1, -(-S // max(1, frame_block)))
    sblk = -(-S // num_steps)
    sblk = ((sblk + 7) // 8) * 8             # sublane-aligned chunk height
    Sp = sblk * num_steps
    if Sp != S:
        # zero-padded frames contribute exactly 0 to the accumulated sum
        xf = jnp.pad(xf, ((0, 0), (0, Sp - S), (0, 0)))

    # VMEM: double-buffered x tile + tiny resident weights + scratch (with slack),
    # capped below v7x's 64 MiB physical VMEM (v5e/v6e have 128 MiB).
    vmem_bytes = 2 * sblk * F * 2 + 2 * (F + 2) * H * 4 + F * 4 + 2 * H * 4
    vmem_limit = int(min(max(4 * vmem_bytes, 16 << 20), 48 << 20))

    out3 = pl.pallas_call(
        action_net_kernel,
        out_shape=jax.ShapeDtypeStruct((N, 1, H), jnp.float32),
        grid_spec=pltpu.PrefetchScalarGridSpec(
            num_scalar_prefetch=0,
            grid=(N, num_steps),
            in_specs=[
                pl.BlockSpec((None, sblk, F), lambda n, s: (n, s, 0)),
                pl.BlockSpec((F, H), lambda n, s: (0, 0)),
                pl.BlockSpec((1, H), lambda n, s: (0, 0)),
            ],
            out_specs=pl.BlockSpec((None, 1, H), lambda n, s: (n, 0, 0)),
            scratch_shapes=[pltpu.VMEM((1, F), jnp.float32)],
        ),
        compiler_params=pltpu.CompilerParams(
            dimension_semantics=("parallel", "arbitrary"),  # batch across TCs on v7x
            vmem_limit_bytes=vmem_limit,
        ),
    )(xf, w_eff, b_eff)
    return out3.reshape(N, H)


# --------------------------- reference (pure JAX) -----------------------------
def action_net_reference(x, params):
    N, M, T, J, C = x.shape
    wb, bb = params["wb"], params["bb"]
    w1, b1 = params["w1"], params["b1"]
    hp = jax.lax.Precision.HIGHEST
    feat = jnp.einsum("nmtjc,cd->nmtjd", x, wb, precision=hp) + bb   # backbone
    feat = jnp.transpose(feat, (0, 1, 3, 4, 2))                      # (N, M, J, D, T)
    feat = jnp.mean(feat, axis=-1)                                   # mean over T
    feat = feat.reshape(N, M, -1)
    feat = jnp.mean(feat, axis=1)                                    # mean over M
    y = jnp.dot(feat, w1, precision=hp) + b1                         # fc1
    norm = jnp.sqrt(jnp.sum(y * y, axis=-1, keepdims=True))
    return y / jnp.maximum(norm, 1e-12)                              # F.normalize


# ------------------------------ main ------------------------------------------
if __name__ == "__main__":
    # Small shapes consistent with ActionNet's forward: (N, M, T, J, C=3)
    N, M, T, J, C = 2, 2, 64, 17, 3
    dim_rep, hidden_dim = 32, 128

    key = jax.random.PRNGKey(0)
    k_x, k_wb, k_bb, k_w1, k_b1 = jax.random.split(key, 5)

    x = jax.random.normal(k_x, (N, M, T, J, C), dtype=jnp.float32)

    params = {
        # synthetic backbone: per-joint linear C -> dim_rep
        "wb": jax.random.normal(k_wb, (C, dim_rep), dtype=jnp.float32) * 0.1,
        "bb": jax.random.normal(k_bb, (dim_rep,), dtype=jnp.float32) * 0.1,
        # head fc1: Linear(dim_rep * num_joints, hidden_dim)
        "w1": jax.random.normal(k_w1, (J * dim_rep, hidden_dim), dtype=jnp.float32)
        * (1.0 / jnp.sqrt(J * dim_rep)),
        "b1": jax.random.normal(k_b1, (hidden_dim,), dtype=jnp.float32) * 0.01,
    }

    ref = action_net_reference(x, params)

    # Default config (large frame chunks -> single reduction step at toy sizes).
    fwd = jax.jit(action_net_forward)
    out = jax.block_until_ready(fwd(x, params))
    assert out.shape == (N, hidden_dim)
    # bf16 x stream -> loosened tolerance vs the f32 HIGHEST reference.
    assert jnp.allclose(out, ref, atol=1e-3, rtol=1e-3), "mismatch vs reference (default)"

    # Small frame chunks: exercises multi-step accumulation + zero-frame padding.
    out_multi = jax.block_until_ready(action_net_forward(x, params, frame_block=24))
    assert jnp.allclose(out_multi, ref, atol=1e-3, rtol=1e-3), "mismatch vs reference (multi-step)"

    print("KERNEL_OK")
</pallas_src>

<mosaic_0001>
module attributes {stable_mosaic.version = 11 : i64} {
  func.func @action_net_kernel(%arg0: i32, %arg1: i32, %arg2: memref<1x128x51xbf16, #tpu.memory_space<vmem>>, %arg3: memref<51x128xf32, #tpu.memory_space<vmem>>, %arg4: memref<1x128xf32, #tpu.memory_space<vmem>>, %arg5: memref<1x1x128xf32, #tpu.memory_space<vmem>>, %arg6: memref<1x51xf32, #tpu.memory_space<vmem>>) attributes {dimension_semantics = [#tpu.dimension_semantics<parallel>, #tpu.dimension_semantics<arbitrary>], iteration_bounds = array<i64: 2, 1>, scalar_prefetch = 0 : i64, scratch_operands = 1 : i64, tpu.core_type = #tpu.core_type<tc>, window_params = [{transform_indices = @transform_0, window_bounds = array<i64: 1, 128, 51>}, {pipeline_mode = #tpu.pipeline_mode<synchronous>, transform_indices = @transform_1, window_bounds = array<i64: 51, 128>}, {pipeline_mode = #tpu.pipeline_mode<synchronous>, transform_indices = @transform_2, window_bounds = array<i64: 1, 128>}, {transform_indices = @transform_3, window_bounds = array<i64: 1, 1, 128>}]} {
    %c0_i32 = arith.constant 0 : i32
    %0 = arith.cmpi eq, %arg1, %c0_i32 : i32
    %1 = arith.extui %0 : i1 to i32
    %c0_i32_0 = arith.constant 0 : i32
    %2 = arith.cmpi ne, %1, %c0_i32_0 : i32
    scf.if %2 {
      %cst_9 = arith.constant 0.000000e+00 : f32
      %14 = vector.broadcast %cst_9 : f32 to vector<1x51xf32>
      %c0_10 = arith.constant 0 : index
      %c0_11 = arith.constant 0 : index
      %15 = vector.load %arg6[%c0_10, %c0_11] : memref<1x51xf32, #tpu.memory_space<vmem>>, vector<1x51xf32>
      tpu.vector_store %arg6[%c0_10, %c0_11], %14 {strides = array<i32>} : memref<1x51xf32, #tpu.memory_space<vmem>>, vector<1x51xf32>,
    } else {
    }
    %c0 = arith.constant 0 : index
    %c0_1 = arith.constant 0 : index
    %3 = vector.load %arg6[%c0, %c0_1] : memref<1x51xf32, #tpu.memory_space<vmem>>, vector<1x51xf32>
    %c0_2 = arith.constant 0 : index
    %c0_3 = arith.constant 0 : index
    %c0_4 = arith.constant 0 : index
    %4 = vector.load %arg2[%c0_2, %c0_3, %c0_4] : memref<1x128x51xbf16, #tpu.memory_space<vmem>>, vector<1x128x51xbf16>
    %5 = vector.shape_cast %4 : vector<1x128x51xbf16> to vector<128x51xbf16>
    %6 = arith.extf %5 : vector<128x51xbf16> to vector<128x51xf32>
    %cst = arith.constant dense<0.000000e+00> : vector<51xf32>
    %7 = vector.multi_reduction <add>, %6, %cst [0] : vector<128x51xf32> to vector<51xf32>
    %8 = vector.shape_cast %7 : vector<51xf32> to vector<1x51xf32>
    %9 = arith.addf %3, %8 : vector<1x51xf32>
    %c0_5 = arith.constant 0 : index
    %c0_6 = arith.constant 0 : index
    %10 = vector.load %arg6[%c0_5, %c0_6] : memref<1x51xf32, #tpu.memory_space<vmem>>, vector<1x51xf32>
    tpu.vector_store %arg6[%c0_5, %c0_6], %9 {strides = array<i32>} : memref<1x51xf32, #tpu.memory_space<vmem>>, vector<1x51xf32>,
    %c0_i32_7 = arith.constant 0 : i32
    %11 = arith.cmpi eq, %arg1, %c0_i32_7 : i32
    %12 = arith.extui %11 : i1 to i32
    %c0_i32_8 = arith.constant 0 : i32
    %13 = arith.cmpi ne, %12, %c0_i32_8 : i32
    scf.if %13 {
      %c0_9 = arith.constant 0 : index
      %c0_10 = arith.constant 0 : index
      %14 = vector.load %arg6[%c0_9, %c0_10] : memref<1x51xf32, #tpu.memory_space<vmem>>, vector<1x51xf32>
      %c0_11 = arith.constant 0 : index
      %c0_12 = arith.constant 0 : index
      %15 = vector.load %arg3[%c0_11, %c0_12] : memref<51x128xf32, #tpu.memory_space<vmem>>, vector<51x128xf32>
      %cst_13 = arith.constant dense<0.000000e+00> : vector<1x128xf32>
      %16 = tpu.matmul %14, %15, %cst_13 {dimension_numbers = #tpu.dot_dimension_numbers<[1], [0], [0], [1], [0, 0, 1, 1], [], []>} : vector<1x51xf32>, vector<51x128xf32>, vector<1x128xf32> -> vector<1x128xf32>
      %c0_14 = arith.constant 0 : index
      %c0_15 = arith.constant 0 : index
      %17 = vector.load %arg4[%c0_14, %c0_15] : memref<1x128xf32, #tpu.memory_space<vmem>>, vector<1x128xf32>
      %18 = arith.addf %16, %17 : vector<1x128xf32>
      %19 = arith.mulf %18, %18 : vector<1x128xf32>
      %cst_16 = arith.constant dense<0.000000e+00> : vector<1xf32>
      %20 = vector.multi_reduction <add>, %19, %cst_16 [1] : vector<1x128xf32> to vector<1xf32>
      %21 = vector.shape_cast %20 : vector<1xf32> to vector<1x1xf32>
      %cst_17 = arith.constant 1.000000e-24 : f32
      %22 = vector.broadcast %cst_17 : f32 to vector<1x1xf32>
      %23 = arith.maximumf %21, %22 : vector<1x1xf32>
      %24 = math.rsqrt %23 : vector<1x1xf32>
      %25 = vector.broadcast %24 : vector<1x1xf32> to vector<1x128xf32>
      %26 = arith.mulf %18, %25 : vector<1x128xf32>
      %c0_18 = arith.constant 0 : index
      %c0_19 = arith.constant 0 : index
      %c0_20 = arith.constant 0 : index
      %27 = vector.load %arg5[%c0_18, %c0_19, %c0_20] : memref<1x1x128xf32, #tpu.memory_space<vmem>>, vector<1x1x128xf32>
      %28 = vector.shape_cast %27 : vector<1x1x128xf32> to vector<1x128xf32>
      %29 = vector.shape_cast %26 : vector<1x128xf32> to vector<1x1x128xf32>
      tpu.vector_store %arg5[%c0_18, %c0_19, %c0_20], %29 {strides = array<i32>} : memref<1x1x128xf32, #tpu.memory_space<vmem>>, vector<1x1x128xf32>,
    } else {
    }
    return
  }
  func.func @transform_0(%arg0: i32, %arg1: i32) -> (i32, i32, i32) {
    %c0_i32 = arith.constant 0 : i32
    %c0_i32_0 = arith.constant 0 : i32
    return %arg0, %arg1, %c0_i32 : i32, i32, i32
  }
  func.func @transform_1(%arg0: i32, %arg1: i32) -> (i32, i32) {
    %c0_i32 = arith.constant 0 : i32
    %c0_i32_0 = arith.constant 0 : i32
    %c0_i32_1 = arith.constant 0 : i32
    return %c0_i32, %c0_i32_0 : i32, i32
  }
  func.func @transform_2(%arg0: i32, %arg1: i32) -> (i32, i32) {
    %c0_i32 = arith.constant 0 : i32
    %c0_i32_0 = arith.constant 0 : i32
    %c0_i32_1 = arith.constant 0 : i32
    return %c0_i32, %c0_i32_0 : i32, i32
  }
  func.func @transform_3(%arg0: i32, %arg1: i32) -> (i32, i32, i32) {
    %c0_i32 = arith.constant 0 : i32
    %c0_i32_0 = arith.constant 0 : i32
    %c0_i32_1 = arith.constant 0 : i32
    return %arg0, %c0_i32, %c0_i32_0 : i32, i32, i32
  }
}

</mosaic_0001>

<bundles_post_ra>
// kernel: tile.9
= control target key start
LH: loop header
LB: loop body
LE: loop exit
PB: predicated region body
PF: predicated region fallthrough
CT: control target
= control target key end

     0   :  { %vm3_vm0 = vcmask 261120   ;;  %s29_s8 = smov 96   ;;  %s30_s13 = smov 32   ;;  %vm9_vm1 = vcmask 1048320   ;;  %vm15_vm2 = vcmask 785920   ;;  %vm21_vm3 = vcmask 523520   ;;  %s66_s0 = inlined_call_operand.vmem [shape: f32[17,32], index: 0, kind: input, shape index: {}]   ;;  %s67_s1 = inlined_call_operand.vmem [shape: f32[544], index: 1, kind: output, shape index: {}]  }
   0x1   :  { %v23_v0 = vld [vmem:[%s66_s0 + $0x3] ss:$4 sm:$0xf]   ;;  %v25_v1 = vld [vmem:[%s66_s0 + $0x1] ss:$4 sm:$0xf]  }
   0x2   :  { %7 = vrot.lane.b32.xlu0 %v23_v0, %s29_s8  ;;  %v24_v2 = vld [vmem:[%s66_s0 + $0x2] ss:$4 sm:$0xf]   ;;  %19 = vrot.lane.b32.xlu1 %v25_v1, %s30_s13  ;;  %v2_v3 = vld [vmem:[%s66_s0] ss:$4 sm:$0x1f]  }
   0x3   :  { %4 = vst.msk [vmem:[%s67_s1] sm:$0x1f] %vm3_vm0, %v2_v3   ;;  %s31_s17 = smov 64  }
   0x6   :  { %13 = vrot.lane.b32.xlu0 %v24_v2, %s31_s17 }
  0x74   :  { %v8_v4 = vpop.permute.xlu0 %7   ;;  %v20_v5 = vpop.permute.xlu1 %19  }
  0x75   :  { %10 = vst.msk [vmem:[%s67_s1] sm:$0xf] %vm9_vm1, %v8_v4  }
  0x78   :  { %v14_v6 = vpop.permute.xlu0 %13  }
  0x79   :  { %16 = vst.msk [vmem:[%s67_s1] sm:$0xf] %vm15_vm2, %v14_v6  }
  0x7a   :  { %22 = vst.msk [vmem:[%s67_s1] sm:$0xf] %vm21_vm3, %v20_v5  }

// kernel: tile.8
= control target key start
LH: loop header
LB: loop body
LE: loop exit
PB: predicated region body
PF: predicated region fallthrough
CT: control target
= control target key end

     0   :  { %2 = vsyncpa [#allocation1], 0  ;;  %s50_s6 = smov [#allocation0]   ;;  %s82_s0 = inlined_call_operand.hbm [shape: f32[32], index: 0, kind: input, shape index: {}]   ;;  %s83_s1 = inlined_call_operand.vmem [shape: f32[17,32], index: 1, kind: output, shape index: {}]  }
   0x1   :  { %s9_s7 = sshll.u32 %s50_s6, 4  ;;  %s26_s10 = scalar_lea.hbm %s82_s0, 16  ;;  %s10_s7 = int_to_ptr.vmem [resolvable:$true] %s9_s7 }
   0x2   :  { %p27_p0 = scmp.ne.s32.totalorder %s82_s0, %s26_s10  ;;  %p30_p1 = scmp.lt.u32.totalorder %s26_s10, %s82_s0 }
   0x4   :  { %p32_p2 = pnand %p30_p1, %p27_p0 }
   0x6   :  { %35 = shalt.err (!%p32_p2)
}
   0x7   :  { %s36_s15 = scalar_lea.vmem %s10_s7, 16  ;;  %s40_s16 = scalar_lea.vmem %s10_s7, 32 }
   0x8   :  { %p37_p3 = scmp.ne.s32.totalorder %s10_s7, %s36_s15  ;;  %p41_p4 = scmp.lt.s32.totalorder %s10_s7, %s10_s7 }
   0x9   :  { %p42_p5 = scmp.lt.s32.totalorder %s40_s16, %s36_s15 }
   0xb   :  { %p43_p6 = por %p42_p5, %p41_p4 }
   0xd   :  { %p44_p7 = pnand %p43_p6, %p37_p3 }
   0xf   :  { %47 = shalt.err (!%p44_p7)
}
  0x10   :  { %12 = dma.hbm_to_vmem [thread:$0]  %s82_s0, 16, %s10_s7, [#allocation1]  }
  0x11   :  { %48 = dma.done.wait [#allocation1], 16  }
  0x12   :  { %49 = vsyncadd [#allocation1], 4294967280  ;;  %v16_v0 = vld [vmem:[#allocation0] ss:$0 sm:$0xff] }
  0x13   :  { %17 = vst [vmem:[%s83_s1] sm:$0xff] %v16_v0  ;;  %23 = vst [vmem:[%s83_s1 + $0x8] sm:$0xff] %v16_v0 }
  0x14   :  { %24 = vst [vmem:[%s83_s1 + $0x10] sm:$0xff] %v16_v0 }
  0x15   :  { %22 = vsyncpa [#allocation1], 1 }

// kernel: action_net_forward.1
= control target key start
LH: loop header
LB: loop body
LE: loop exit
PB: predicated region body
PF: predicated region fallthrough
CT: control target
= control target key end

     0   :  { %8 = vsyncpa [#allocation4], 0  ;;  %s871_s0 = inlined_call_operand.vmem [shape: bf16[2,128,51], index: 0, kind: input, shape index: {}]   ;;  %s872_s1 = inlined_call_operand.vmem [shape: f32[51,128], index: 1, kind: input, shape index: {}]   ;;  %s873_s2 = inlined_call_operand.vmem [shape: f32[1,128], index: 2, kind: input, shape index: {}]   ;;  %s874_s3 = inlined_call_operand.hbm [shape: f32[2,1,128], index: 3, kind: output, shape index: {}]  }
   0x1   :  { %10 = vsyncpa [#allocation4 + $0x1], 0  ;;  %s706_s12 = smov 0   ;;  %s708_s13 = smov 0  }
   0x2   :  { %s710_s14 = smov 0   ;;  %s712_s15 = smov 0  }
   0x3   :  { %s714_s16 = smov 0   ;;  %s716_s17 = smov 0  }
   0x4 LB: > { %s456_s18 = sadd.s32 4294967295, %s680_s17   ;;  %s457_s19 = sadd.s32 4294967294, %s680_s17   ;;  %s680_s17 = sphi %s716_s17, %s16_s17   ;;  %s676_s16 = sphi %s714_s16, %s881_s16   ;;  %s672_s15 = sphi %s712_s15, %s880_s15   ;;  %s668_s14 = sphi %s710_s14, %s879_s14   ;;  %s664_s13 = sphi %s708_s13, %s878_s13   ;;  %s660_s12 = sphi %s706_s12, %s877_s12  }
   0x5   : > { %s28_s20 = sadd.s32 1, %s676_s16  ;;  %s105_s21 = sadd.s32 1, %s668_s14 }
   0x6   : > { %p30_p0 = scmp.ge.s32.totalorder %s28_s20, 2  ;;  %p115_p1 = scmp.ne.s32.totalorder %s668_s14, %s664_s13 }
   0x7   : > { %p116_p2 = scmp.eq.s32.totalorder %s456_s18, 1  ;;  %p121_p3 = scmp.ne.s32.totalorder %s664_s13, %s660_s12 }
   0x8   : > { %s883_s20 = smov (%p30_p0, %s28_s20), 0  ;;  %p122_p5 = scmp.eq.s32.totalorder %s457_s19, 1 }
   0x9   : > { %p746_p4 = por %p116_p2, %p115_p1  ;;  %s102_s23 = ssub.s32 %s676_s16, %s883_s20 }
   0xa   : > { %p460_p6 = scmp.ge.s32.totalorder %s680_s17, 1  ;;  %p103_p7 = scmp.eq.s32.totalorder %s102_s23, 0 }
   0xb   : > { %p753_p8 = por %p122_p5, %p121_p3  ;;  %p159_p9 = scmp.lt.s32.totalorder %s680_s17, 3 }
   0xc   : > { %s759_s25 = scalar_select %p103_p7, %s668_s14, %s105_s21  }
   0xd   : > { %p160_p10 = pnand %p460_p6, %p159_p9 }
   0xe   : > { %v280_v0 = vld [vmem:[%s872_s1] sm:$0xff] (!%p160_p10)  ;;  %v281_v1 = vld [vmem:[%s872_s1 + $0x8] sm:$0xff] (!%p160_p10)  ;;  %v282_v2 = vld [vmem:[%s872_s1 + $0x10] sm:$0xff] (!%p160_p10)  ;;  %p187_p11 = scmp.lt.s32.totalorder (!%p160_p10), %s672_s15, 1  ;;  %vm200_vm0 = vcmask (!%p160_p10), 409600   ;;  %v682_v3 = vmov (!%p160_p10), 0.0|0.0  }
   0xf   : > { %163 = sbr.rel (%p160_p10) target bundleno = 470 (0x1d6), region = 32  ;;  %533 = vmatprep.subr.bf16.mxu0 (!%p160_p10), %v682_v3  ;;  %v534_v4 = vpack.c.bf16 (!%p160_p10), %v281_v1, %v280_v0  ;;  %v283_v5 = vld [vmem:[%s872_s1 + $0x18] sm:$0xff] (!%p160_p10)  ;;  %v683_v6 = vmov (!%p160_p10), 0.0   ;;  %vm684_vm1 = vmmov (!%p160_p10), 0   ;;  %v284_v8 = vld [vmem:[%s872_s1 + $0x20] sm:$0xff] (!%p160_p10)  ;;  %v285_v9 = vld [vmem:[%s872_s1 + $0x28] sm:$0xff] (!%p160_p10) }
  0x10   : > { %201 = vst.msk [vmem:[#allocation2] sm:$0x1] (!%p160_p10), %vm200_vm0, %v683_v6  ;;  %v537_v7 = vpack.c.bf16 (!%p160_p10), %v283_v5, %v282_v2  ;;  %530 = vmatprep.mubr.msk.f32.mxu0 (!%p160_p10), %vm684_vm1, %v683_v6  ;;  %v540_v12 = vpack.c.bf16 (!%p160_p10), %v285_v9, %v284_v8  ;;  %vm235_vm2 = vcmask (!%p160_p10), 416768   ;;  %v286_v24 = vld [vmem:[%s872_s1 + $0x30] sm:$0x7] (!%p160_p10)  ;;  %vm291_vm3 = vcmask (!%p160_p10), 1042432  }
  0x11   : > { %535 = vmatpush3.bf16.msra.mxu0 (!%p160_p10), %v534_v4  ;;  %vm366_vm4 = vcmask (!%p160_p10), 1040384   ;;  %s184_s30 = sand.u32 (!%p160_p10), 1, %s664_s13   ;;  %s465_s4 = sshll.u32 (!%p160_p10), %s672_s15, 4 }
  0x12   : > { %536 = vmatprep.subr.bf16.mxu0 (!%p160_p10), %v682_v3  ;;  %s185_s5 = scalar_lea.vmem (!%p160_p10), [#allocation3], %s184_s30  ;;  %s824_s9 = scalar_lea.hbm (!%p160_p10), %s874_s3, %s465_s4 }
  0x13   : > { %s387_s6 = sshll.u32 (!%p160_p10), %s185_s5, 4  ;;  %s375_s10 = scalar_lea.sflag (!%p160_p10), [#allocation4], %s184_s30  ;;  %s826_s6 = int_to_ptr.vmem [resolvable:$true] %s387_s6 }
  0x14   : > { %s602_s11 = scalar_lea.vmem (!%p160_p10), %s826_s6, 16 }
  0x15   : > { %538 = vmatpush3.bf16.msra.mxu0 (!%p160_p10), %v537_v7  ;;  %p603_p12 = scmp.ne.s32.totalorder (!%p160_p10), %s826_s6, %s602_s11 }
  0x16   : > { %s188_s7 = scalar_select %p187_p11, %s672_s15, 1  ;;  %539 = vmatprep.subr.bf16.mxu0 %v682_v3 }
  0x17   : > { %v202_v8 = vld [vmem:[#allocation2] sm:$0x1]  ;;  %p604_p13 = pnand %p603_p12, %p746_p4  ;;  %s685_s15 = smov [#allocation3]  }
  0x18   : > { %s468_s18 = sshll.u32 %s188_s7, 6 }
  0x19   : > { %s785_s23 = scalar_lea.vmem %s871_s0, %s468_s18  ;;  %541 = vmatpush3.bf16.msra.mxu0 %v540_v12  ;;  %v287_v12 = vld [vmem:[%s873_s2] sm:$0x1]  ;;  %p605_p0 = pneg %p604_p13 }
  0x1a   : > { %v470_v10 = vld [vmem:[%s785_s23] sm:$0xff]   ;;  %v501_v11 = vld [vmem:[%s785_s23 + $0x8] sm:$0xff]   ;;  %v502_v16 = vld [vmem:[%s785_s23 + $0x10] sm:$0xff]   ;;  %528 = vmatprep.subr.mxu0 %v683_v6  ;;  %s606_s18 = sshll.u32 %s685_s15, 4  ;;  %s607_s18 = int_to_ptr.vmem [resolvable:$false] %s606_s18 }
  0x1b   : > { %v471_v13 = vunpack.c.l.bf16 %v470_v10  ;;  %v472_v14 = vunpack.c.h.bf16 %v470_v10  ;;  %v475_v15 = vunpack.c.l.bf16 %v501_v11  ;;  %v476_v17 = vunpack.c.h.bf16 %v501_v11  ;;  %v503_v22 = vld [vmem:[%s785_s23 + $0x18] sm:$0xff]   ;;  %v504_v30 = vld [vmem:[%s785_s23 + $0x20] sm:$0xff]   ;;  %v505_v37 = vld [vmem:[%s785_s23 + $0x28] sm:$0xff]   ;;  %s608_s19 = scalar_lea.vmem %s607_s18, 32  ;;  %p609_p1 = scmp.lt.s32.totalorder %s826_s6, %s607_s18 }
  0x1c   : > { %v479_v18 = vunpack.c.l.bf16 %v502_v16  ;;  %v480_v25 = vunpack.c.h.bf16 %v502_v16  ;;  %v483_v28 = vunpack.c.l.bf16 %v503_v22  ;;  %v484_v32 = vunpack.c.h.bf16 %v503_v22  ;;  %v506_v44 = vld [vmem:[%s785_s23 + $0x30] sm:$0xff]   ;;  %v507_v51 = vld [vmem:[%s785_s23 + $0x38] sm:$0xff]   ;;  %p610_p2 = scmp.lt.s32.totalorder %s608_s19, %s602_s11 }
  0x1d   : > { %v236_v19 = vsel %vm235_vm2, %v471_v13, 0.0  ;;  %v237_v20 = vsel %vm235_vm2, %v472_v14, 0.0  ;;  %v239_v21 = vsel %vm235_vm2, %v475_v15, 0.0  ;;  %v241_v26 = vsel %vm235_vm2, %v476_v17, 0.0  ;;  %529 = vmatpush3.msk.msra.mxu0 %vm291_vm3, %v286_v24 }
  0x1e   : > { %v238_v23 = vadd.f32 %v237_v20, %v236_v19  ;;  %v243_v29 = vsel %vm235_vm2, %v479_v18, 0.0  ;;  %v245_v33 = vsel %vm235_vm2, %v480_v25, 0.0  ;;  %v487_v35 = vunpack.c.l.bf16 %v504_v30  ;;  %p611_p3 = por %p610_p2, %p609_p1 }
  0x1f   : > { %v247_v36 = vsel %vm235_vm2, %v483_v28, 0.0  ;;  %v488_v39 = vunpack.c.h.bf16 %v504_v30  ;;  %v249_v40 = vsel %vm235_vm2, %v484_v32, 0.0  ;;  %v491_v42 = vunpack.c.l.bf16 %v505_v37 }
  0x20   : > { %v240_v27 = vadd.f32 %v239_v21, %v238_v23  ;;  %v251_v43 = vsel %vm235_vm2, %v487_v35, 0.0  ;;  %v492_v46 = vunpack.c.h.bf16 %v505_v37  ;;  %v495_v49 = vunpack.c.l.bf16 %v506_v44  ;;  %p612_p5 = pnand %p611_p3, %p605_p0 }
  0x21   : > { %v253_v47 = vsel %vm235_vm2, %v488_v39, 0.0  ;;  %v255_v50 = vsel %vm235_vm2, %v491_v42, 0.0  ;;  %v496_v53 = vunpack.c.h.bf16 %v506_v44  ;;  %v499_v56 = vunpack.c.l.bf16 %v507_v51 }
  0x22   : > { %v242_v31 = vadd.f32 %v241_v26, %v240_v27  ;;  %v257_v54 = vsel %vm235_vm2, %v492_v46, 0.0  ;;  %v259_v57 = vsel %vm235_vm2, %v495_v49, 0.0  ;;  %v500_v59 = vunpack.c.h.bf16 %v507_v51 }
  0x23   : > { %v261_v60 = vsel %vm235_vm2, %v496_v53, 0.0  ;;  %v263_v62 = vsel %vm235_vm2, %v499_v56, 0.0 }
  0x24   : > { %v244_v34 = vadd.f32 %v243_v29, %v242_v31  ;;  %v265_v0 = vsel %vm235_vm2, %v500_v59, 0.0 }
  0x26   : > { %v246_v38 = vadd.f32 %v245_v33, %v244_v34 }
  0x28   : > { %v248_v41 = vadd.f32 %v247_v36, %v246_v38 }
  0x2a   : > { %v250_v45 = vadd.f32 %v249_v40, %v248_v41 }
  0x2c   : > { %v252_v48 = vadd.f32 %v251_v43, %v250_v45 }
  0x2e   : > { %v254_v52 = vadd.f32 %v253_v47, %v252_v48 }
  0x30   : > { %v256_v55 = vadd.f32 %v255_v50, %v254_v52 }
  0x32   : > { %v258_v58 = vadd.f32 %v257_v54, %v256_v55 }
  0x34   : > { %v260_v61 = vadd.f32 %v259_v57, %v258_v58 }
  0x36   : > { %v262_v63 = vadd.f32 %v261_v60, %v260_v61 }
  0x38   : > { %v264_v1 = vadd.f32 %v263_v62, %v262_v63 }
  0x3a   : > { %v266_v2 = vadd.f32 %v265_v0, %v264_v1 }
  0x3c   : > { %v267_v3 = vrot.slane %v266_v2, 4 }
  0x3e   : > { %v268_v4 = vadd.f32 %v267_v3, %v266_v2 }
  0x40   : > { %v269_v5 = vrot.slane %v268_v4, 2 }
  0x42   : > { %v270_v6 = vadd.f32 %v269_v5, %v268_v4 }
  0x44   : > { %v271_v7 = vrot.slane %v270_v6, 1 }
  0x46   : > { %v272_v9 = vadd.f32 %v271_v7, %v270_v6 }
  0x48   : > { %v273_v10 = vadd.f32 %v272_v9, %v202_v8 }
  0x4a   : > { %275 = vst.msk [vmem:[#allocation2] sm:$0x1] %vm200_vm0, %v273_v10 }
  0x51   : > { %v279_v11 = vld [vmem:[#allocation2] sm:$0x1] }
  0x52   : > { %531 = vmatmul.mubr.msk.f32.vlgmr.msra.gmra.mrb[0].mxu0 %vm235_vm2, %v279_v11 }
 0x125   : > { %v361_v13 = vpop.f32.mrb[0].mxu0 }
 0x126   : > { %v362_v14 = vadd.f32 %v361_v13, %v287_v12  ;;  %v532_v15 = vpop.f32.mrb[1].mxu0 }
 0x128   : > { %v365_v16 = vmul.f32 %v362_v14, %v362_v14 }
 0x12a   : > { %v367_v17 = vsel %vm366_vm4, %v365_v16, 0.0 }
 0x12b   : > { %368 = vadd.xlane.f32.xlu0 %v367_v17 }
 0x1b8   : > { %v369_v18 = vpop.xlane.xlu0 %368 }
 0x1b9   : > { %v370_v19 = vmax.f32 %v369_v18, 1e-24 }
 0x1bb   : > { %600 = vrsqrt.f32 %v370_v19 }
 0x1c5   : > { %v601_v20 = vpop.eup %600 }
 0x1c6   : > { %v372_v21 = vmul.f32 %v601_v20, %v362_v14 }
 0x1c8   : > { %373 = vst [vmem:[%s185_s5] sm:$0x1] %v372_v21 }
 0x1c9   : > { %615 = shalt.err (!%p612_p5)
}
 0x1ca   : > { %s616_s21 = scalar_lea.hbm %s824_s9, 16  ;;  %s620_s27 = scalar_lea.hbm %s874_s3, 32 }
 0x1cb   : > { %p617_p6 = scmp.ne.s32.totalorder %s824_s9, %s616_s21  ;;  %p621_p10 = scmp.lt.u32.totalorder %s824_s9, %s874_s3 }
 0x1cc   : > { %p622_p11 = scmp.lt.u32.totalorder %s620_s27, %s616_s21  ;;  %p624_p13 = scmp.lt.u32.totalorder %s616_s21, %s824_s9 }
 0x1cd   : > { %p618_p7 = pnand %p617_p6, %p746_p4 }
 0x1ce   : > { %p623_p12 = por %p622_p11, %p621_p10 }
 0x1cf   : > { %p619_p9 = pneg %p618_p7 }
 0x1d0   : > { %p625_p0 = por %p624_p13, %p623_p12 }
 0x1d2   : > { %p626_p1 = pnand %p625_p0, %p619_p9 }
 0x1d4   : > { %629 = shalt.err (!%p626_p1)
}
 0x1d5   : > { %542 = dma.vmem_to_hbm [thread:$0]  (%p746_p4), %s826_s6, 16, %s824_s9, %s375_s10  }
 0x1d6 PF: > { %p548_p2 = scmp.ge.s32.totalorder %s680_s17, 2  ;;  %s399_s30 = sand.u32 1, %s660_s12  }
 0x1d7   : > { %s400_s4 = scalar_lea.sflag [#allocation4], %s399_s30 }
 0x1d8   : > { %p545_p3 = pnand %p548_p2, %p753_p8 }
 0x1da   : > { %655 = dma.done.wait (!%p545_p3), %s400_s4, 16  }
 0x1db   : > { %657 = vsyncadd (!%p545_p3), %s400_s4, 4294967280  ;;  %s16_s17 = sadd.s32 1, %s680_s17   ;;  %s877_s12 = smov %s664_s13 }
 0x1dc   : > { %p13_p5 = scmp.ge.s32.totalorder %s16_s17, 4   ;;  %s878_s13 = smov %s668_s14 }
 0x1dd   : > { %s879_s14 = smov %s759_s25  ;;  %s880_s15 = smov %s676_s16 }
 0x1de   : > { %s881_s16 = smov %s883_s20  ;;  %15 = sbr.rel (!%p13_p5) target bundleno = 4 (0x4), region = 75 }
 0x1e5   :  { %404 = vsyncpa [#allocation4], 1 }
 0x1e6   :  { %406 = vsyncpa [#allocation4 + $0x1], 1 }

</bundles_post_ra>
